<compile_context>
chip_gen: v7x
topology: tpu7x:2x2x1
jax: 0.10.0
libtpu: 0.0.40
codegen_flags: <defaults>
</compile_context>

<pallas_src>
import jax
import jax.numpy as jnp
from jax.experimental import pallas as pl
from jax.experimental.pallas import tpu as pltpu

_EPS = 1e-5
_K = 3  # Conv1d kernel size in the PyTorch module


# ------------------------- kernel-side math helpers -------------------------
def _conv1d_relu(x, w, b):
    # x: (L, Cin) f32, w: (K*Cin, Cout) bf16 (im2col layout), b: (1, Cout) f32
    L_out = x.shape[0] - _K + 1
    # im2col on the contraction (lane) axis: one wide-K MXU push per conv.
    cols = jnp.concatenate([x[k:k + L_out, :] for k in range(_K)], axis=-1)
    y = jnp.dot(cols.astype(jnp.bfloat16), w,
                preferred_element_type=jnp.float32)            # f32 accumulate
    return jnp.maximum(y + b, 0.0)


def _head(xs, w1, b1, gamma, beta, w2, b2):
    # Conv1d -> ReLU -> BatchNorm1d(train) -> Conv1d -> ReLU
    #   -> AdaptiveMaxPool1d(1) -> Flatten,  per-batch unrolled (B small, static).
    # xs: list of per-batch (L, Cin) f32 slabs; returns (B, 2H) f32.
    ys = [_conv1d_relu(x, w1, b1) for x in xs]                 # each (L1, 2H) f32

    # single-pass biased batch stats over (B, L) per channel
    n = sum(y.shape[0] for y in ys)
    s1 = ys[0].sum(axis=0, keepdims=True)                      # (1, 2H)
    s2 = (ys[0] * ys[0]).sum(axis=0, keepdims=True)
    for y in ys[1:]:
        s1 = s1 + y.sum(axis=0, keepdims=True)
        s2 = s2 + (y * y).sum(axis=0, keepdims=True)
    mean = s1 * (1.0 / n)
    var = s2 * (1.0 / n) - mean * mean
    scale = jax.lax.rsqrt(var + _EPS) * gamma                  # (1, 2H), EUP rsqrt
    shift = beta - mean * scale

    outs = []
    for y in ys:
        z = _conv1d_relu(y * scale + shift, w2, b2)            # (L2, 2H) f32
        outs.append(jnp.max(z, axis=0, keepdims=True))         # global max pool
    return jnp.concatenate(outs, axis=0)                       # (B, 2H) f32


# --------------------------------- kernel -----------------------------------
def three_inputs_kernel(title_ref, desc_ref, cat_ref,
                        w1t_ref, b1t_ref, gt_ref, bet_ref, w2t_ref, b2t_ref,
                        w1d_ref, b1d_ref, gd_ref, bed_ref, w2d_ref, b2d_ref,
                        wcat_ref, bcat_ref,
                        wot_ref, wod_ref, woc_ref, bout_ref,
                        out_ref):
    B = title_ref.shape[0]

    title_out = _head([title_ref[b] for b in range(B)],
                      w1t_ref[...], b1t_ref[...], gt_ref[...], bet_ref[...],
                      w2t_ref[...], b2t_ref[...])              # (B, 2H) f32
    desc_out = _head([desc_ref[b] for b in range(B)],
                     w1d_ref[...], b1d_ref[...], gd_ref[...], bed_ref[...],
                     w2d_ref[...], b2d_ref[...])               # (B, 2H) f32
    cat_out = jnp.dot(cat_ref[...], wcat_ref[...],
                      preferred_element_type=jnp.float32) + bcat_ref[...]

    # fc_out on concat([title, desc, cat], dim=1): a VPU multiply against three
    # lane-dense (1, 2H) weight rows + one lane reduction (XLU), instead of
    # three worst-case N=1 MXU matmuls.
    prod = (title_out * wot_ref[...]
            + desc_out * wod_ref[...]
            + cat_out * woc_ref[...])                          # (B, 2H) f32, VPU
    out_ref[...] = jnp.sum(prod, axis=-1, keepdims=True) + bout_ref[...]


# --------------------------------- wrapper ----------------------------------
def three_inputs_net(title_ix, desc_ix, cat_feats, params):
    # Embedding lookups are pure gathers -> kept as XLA glue (see TODO above).
    title_emb = params['title_emb'][title_ix]                  # (B, Lt, H) f32
    desc_emb = params['desc_emb'][desc_ix]                     # (B, Ld, H) f32
    B = title_ix.shape[0]
    H2 = params['gt'].shape[1]

    def conv_w(w):  # (K, Cin, Cout) -> im2col (K*Cin, Cout) slab, bf16 for MXU
        return w.reshape(-1, w.shape[-1]).astype(jnp.bfloat16)

    wout = params['wout']                                      # (6H, 1) f32
    wo_rows = [wout[i * H2:(i + 1) * H2, 0].reshape(1, H2) for i in range(3)]

    args = (
        title_emb, desc_emb, cat_feats,
        conv_w(params['w1t']), params['b1t'], params['gt'], params['bet'],
        conv_w(params['w2t']), params['b2t'],
        conv_w(params['w1d']), params['b1d'], params['gd'], params['bed'],
        conv_w(params['w2d']), params['b2d'],
        params['wcat'], params['bcat'],
        wo_rows[0], wo_rows[1], wo_rows[2], params['bout'],
    )
    vmem = pl.BlockSpec(memory_space=pltpu.MemorySpace.VMEM)
    out = pl.pallas_call(
        three_inputs_kernel,
        out_shape=jax.ShapeDtypeStruct((B, 1), jnp.float32),
        in_specs=[vmem] * len(args),
        out_specs=vmem,
    )(*args)
    return out[:, 0]  # out.squeeze(1)


# pure-JAX reference (tap-loop conv, two-pass BN) mirroring the kernel's
# bf16-matmul-operand / f32-accumulate policy, for a structural cross-check.
def three_inputs_net_ref(title_ix, desc_ix, cat_feats, p):
    bf16 = jnp.bfloat16

    def conv_relu(x, w, b):  # x (B,L,Cin) f32, w (K,Cin,Cout) f32, b (1,Cout) f32
        K = w.shape[0]
        Lo = x.shape[1] - K + 1
        y = jnp.zeros((x.shape[0], Lo, w.shape[2]), jnp.float32)
        for k in range(K):
            y = y + jnp.einsum('blc,co->blo',
                               x[:, k:k + Lo, :].astype(bf16), w[k].astype(bf16),
                               preferred_element_type=jnp.float32)
        return jnp.maximum(y + b[0][None, None, :], 0.0)

    def bn(y, g, be):
        m = jnp.mean(y, axis=(0, 1), keepdims=True)
        v = jnp.mean((y - m) ** 2, axis=(0, 1), keepdims=True)
        return ((y - m) * jax.lax.rsqrt(v + _EPS) * g[0][None, None, :]
                + be[0][None, None, :])

    def head(x, w1, b1, g, be, w2, b2):
        y = conv_relu(x, w1, b1)
        y = bn(y, g, be)
        y = conv_relu(y, w2, b2)
        return jnp.max(y, axis=1)

    te = p['title_emb'][title_ix]
    de = p['desc_emb'][desc_ix]
    t = head(te, p['w1t'], p['b1t'], p['gt'], p['bet'], p['w2t'], p['b2t'])
    d = head(de, p['w1d'], p['b1d'], p['gd'], p['bed'], p['w2d'], p['b2d'])
    c = cat_feats @ p['wcat'] + p['bcat']
    cat = jnp.concatenate([t, d, c], axis=1)
    return (cat @ p['wout'] + p['bout'])[:, 0]


def init_params(key, n_tokens, n_cat_features, hid_size):
    H, H2 = hid_size, 2 * hid_size
    ks = jax.random.split(key, 16)

    def w(k, shape, scale=0.1):
        return scale * jax.random.normal(k, shape, jnp.float32)

    return dict(
        title_emb=w(ks[0], (n_tokens, H)),
        desc_emb=w(ks[1], (n_tokens, H)),
        # PyTorch Conv1d weight (Cout, Cin, K) stored pre-transposed as (K, Cin, Cout)
        w1t=w(ks[2], (H2, H, 3)).transpose(2, 1, 0),
        b1t=w(ks[3], (1, H2), 0.05),
        gt=jnp.ones((1, H2), jnp.float32),
        bet=jnp.zeros((1, H2), jnp.float32),
        w2t=w(ks[4], (H2, H2, 3)).transpose(2, 1, 0),
        b2t=w(ks[5], (1, H2), 0.05),
        w1d=w(ks[6], (H2, H, 3)).transpose(2, 1, 0),
        b1d=w(ks[7], (1, H2), 0.05),
        gd=jnp.ones((1, H2), jnp.float32),
        bed=jnp.zeros((1, H2), jnp.float32),
        w2d=w(ks[8], (H2, H2, 3)).transpose(2, 1, 0),
        b2d=w(ks[9], (1, H2), 0.05),
        # Linear(n_cat_features, 2H): weight (2H, n_cat) stored transposed (n_cat, 2H)
        wcat=w(ks[10], (H2, n_cat_features)).T,
        bcat=w(ks[11], (1, H2), 0.05),
        # Linear(6H, 1): weight (1, 6H) stored transposed (6H, 1)
        wout=w(ks[12], (1, 6 * hid_size)).T,
        bout=w(ks[13], (1, 1), 0.05),
    )


if __name__ == "__main__":
    n_tokens, n_cat_features, hid_size = 50, 8, 32
    B, Lt, Ld = 2, 8, 10

    key = jax.random.PRNGKey(0)
    kp, k1, k2, k3 = jax.random.split(key, 4)
    params = init_params(kp, n_tokens, n_cat_features, hid_size)

    title_ix = jax.random.randint(k1, (B, Lt), 0, n_tokens, jnp.int32)
    desc_ix = jax.random.randint(k2, (B, Ld), 0, n_tokens, jnp.int32)
    cat_feats = jax.random.normal(k3, (B, n_cat_features), jnp.float32)

    out = jax.block_until_ready(three_inputs_net(title_ix, desc_ix, cat_feats, params))
    ref = jax.block_until_ready(three_inputs_net_ref(title_ix, desc_ix, cat_feats, params))

    assert out.shape == (B,), out.shape
    assert jnp.allclose(out, ref, atol=2e-2, rtol=2e-2), (out, ref)
    print("KERNEL_OK")
</pallas_src>

<mosaic_0001>
module attributes {stable_mosaic.version = 11 : i64} {
  func.func @three_inputs_kernel(%arg0: memref<2x8x32xf32, #tpu.memory_space<vmem>>, %arg1: memref<2x10x32xf32, #tpu.memory_space<vmem>>, %arg2: memref<2x8xf32, #tpu.memory_space<vmem>>, %arg3: memref<96x64xbf16, #tpu.memory_space<vmem>>, %arg4: memref<1x64xf32, #tpu.memory_space<vmem>>, %arg5: memref<1x64xf32, #tpu.memory_space<vmem>>, %arg6: memref<1x64xf32, #tpu.memory_space<vmem>>, %arg7: memref<192x64xbf16, #tpu.memory_space<vmem>>, %arg8: memref<1x64xf32, #tpu.memory_space<vmem>>, %arg9: memref<96x64xbf16, #tpu.memory_space<vmem>>, %arg10: memref<1x64xf32, #tpu.memory_space<vmem>>, %arg11: memref<1x64xf32, #tpu.memory_space<vmem>>, %arg12: memref<1x64xf32, #tpu.memory_space<vmem>>, %arg13: memref<192x64xbf16, #tpu.memory_space<vmem>>, %arg14: memref<1x64xf32, #tpu.memory_space<vmem>>, %arg15: memref<8x64xf32, #tpu.memory_space<vmem>>, %arg16: memref<1x64xf32, #tpu.memory_space<vmem>>, %arg17: memref<1x64xf32, #tpu.memory_space<vmem>>, %arg18: memref<1x64xf32, #tpu.memory_space<vmem>>, %arg19: memref<1x64xf32, #tpu.memory_space<vmem>>, %arg20: memref<1x1xf32, #tpu.memory_space<vmem>>, %arg21: memref<2x1xf32, #tpu.memory_space<vmem>>) attributes {dimension_semantics = [], scalar_prefetch = 0 : i64, scratch_operands = 0 : i64, tpu.core_type = #tpu.core_type<tc>} {
    %c0 = arith.constant 0 : index
    %c0_0 = arith.constant 0 : index
    %c0_1 = arith.constant 0 : index
    %0 = vector.load %arg0[%c0, %c0_0, %c0_1] : memref<2x8x32xf32, #tpu.memory_space<vmem>>, vector<1x8x32xf32>
    %1 = vector.shape_cast %0 : vector<1x8x32xf32> to vector<8x32xf32>
    %c1 = arith.constant 1 : index
    %c0_2 = arith.constant 0 : index
    %c0_3 = arith.constant 0 : index
    %2 = vector.load %arg0[%c1, %c0_2, %c0_3] : memref<2x8x32xf32, #tpu.memory_space<vmem>>, vector<1x8x32xf32>
    %3 = vector.shape_cast %2 : vector<1x8x32xf32> to vector<8x32xf32>
    %c0_4 = arith.constant 0 : index
    %c0_5 = arith.constant 0 : index
    %4 = vector.load %arg3[%c0_4, %c0_5] : memref<96x64xbf16, #tpu.memory_space<vmem>>, vector<96x64xbf16>
    %c0_6 = arith.constant 0 : index
    %c0_7 = arith.constant 0 : index
    %5 = vector.load %arg4[%c0_6, %c0_7] : memref<1x64xf32, #tpu.memory_space<vmem>>, vector<1x64xf32>
    %c0_8 = arith.constant 0 : index
    %c0_9 = arith.constant 0 : index
    %6 = vector.load %arg5[%c0_8, %c0_9] : memref<1x64xf32, #tpu.memory_space<vmem>>, vector<1x64xf32>
    %c0_10 = arith.constant 0 : index
    %c0_11 = arith.constant 0 : index
    %7 = vector.load %arg6[%c0_10, %c0_11] : memref<1x64xf32, #tpu.memory_space<vmem>>, vector<1x64xf32>
    %c0_12 = arith.constant 0 : index
    %c0_13 = arith.constant 0 : index
    %8 = vector.load %arg7[%c0_12, %c0_13] : memref<192x64xbf16, #tpu.memory_space<vmem>>, vector<192x64xbf16>
    %c0_14 = arith.constant 0 : index
    %c0_15 = arith.constant 0 : index
    %9 = vector.load %arg8[%c0_14, %c0_15] : memref<1x64xf32, #tpu.memory_space<vmem>>, vector<1x64xf32>
    %10 = vector.extract_strided_slice %1 {offsets = [0, 0], sizes = [6, 32], strides = [1, 1]} : vector<8x32xf32> to vector<6x32xf32>
    %11 = vector.extract_strided_slice %1 {offsets = [1, 0], sizes = [6, 32], strides = [1, 1]} : vector<8x32xf32> to vector<6x32xf32>
    %12 = vector.extract_strided_slice %1 {offsets = [2, 0], sizes = [6, 32], strides = [1, 1]} : vector<8x32xf32> to vector<6x32xf32>
    %13 = tpu.concatenate %10, %11, %12 in 1 : vector<6x32xf32>, vector<6x32xf32>, vector<6x32xf32> -> vector<6x96xf32>
    %14 = arith.truncf %13 : vector<6x96xf32> to vector<6x96xbf16>
    %cst = arith.constant dense<0.000000e+00> : vector<6x64xf32>
    %15 = tpu.matmul %14, %4, %cst {dimension_numbers = #tpu.dot_dimension_numbers<[1], [0], [0], [1], [0, 0, 1, 1], [], []>} : vector<6x96xbf16>, vector<96x64xbf16>, vector<6x64xf32> -> vector<6x64xf32>
    %16 = vector.broadcast %5 : vector<1x64xf32> to vector<6x64xf32>
    %17 = arith.addf %15, %16 : vector<6x64xf32>
    %cst_16 = arith.constant 0.000000e+00 : f32
    %18 = vector.broadcast %cst_16 : f32 to vector<6x64xf32>
    %19 = arith.maximumf %17, %18 : vector<6x64xf32>
    %20 = vector.extract_strided_slice %3 {offsets = [0, 0], sizes = [6, 32], strides = [1, 1]} : vector<8x32xf32> to vector<6x32xf32>
    %21 = vector.extract_strided_slice %3 {offsets = [1, 0], sizes = [6, 32], strides = [1, 1]} : vector<8x32xf32> to vector<6x32xf32>
    %22 = vector.extract_strided_slice %3 {offsets = [2, 0], sizes = [6, 32], strides = [1, 1]} : vector<8x32xf32> to vector<6x32xf32>
    %23 = tpu.concatenate %20, %21, %22 in 1 : vector<6x32xf32>, vector<6x32xf32>, vector<6x32xf32> -> vector<6x96xf32>
    %24 = arith.truncf %23 : vector<6x96xf32> to vector<6x96xbf16>
    %cst_17 = arith.constant dense<0.000000e+00> : vector<6x64xf32>
    %25 = tpu.matmul %24, %4, %cst_17 {dimension_numbers = #tpu.dot_dimension_numbers<[1], [0], [0], [1], [0, 0, 1, 1], [], []>} : vector<6x96xbf16>, vector<96x64xbf16>, vector<6x64xf32> -> vector<6x64xf32>
    %26 = vector.broadcast %5 : vector<1x64xf32> to vector<6x64xf32>
    %27 = arith.addf %25, %26 : vector<6x64xf32>
    %cst_18 = arith.constant 0.000000e+00 : f32
    %28 = vector.broadcast %cst_18 : f32 to vector<6x64xf32>
    %29 = arith.maximumf %27, %28 : vector<6x64xf32>
    %cst_19 = arith.constant dense<0.000000e+00> : vector<64xf32>
    %30 = vector.multi_reduction <add>, %19, %cst_19 [0] : vector<6x64xf32> to vector<64xf32>
    %31 = vector.shape_cast %30 : vector<64xf32> to vector<1x64xf32>
    %32 = arith.mulf %19, %19 : vector<6x64xf32>
    %cst_20 = arith.constant dense<0.000000e+00> : vector<64xf32>
    %33 = vector.multi_reduction <add>, %32, %cst_20 [0] : vector<6x64xf32> to vector<64xf32>
    %34 = vector.shape_cast %33 : vector<64xf32> to vector<1x64xf32>
    %cst_21 = arith.constant dense<0.000000e+00> : vector<64xf32>
    %35 = vector.multi_reduction <add>, %29, %cst_21 [0] : vector<6x64xf32> to vector<64xf32>
    %36 = vector.shape_cast %35 : vector<64xf32> to vector<1x64xf32>
    %37 = arith.addf %31, %36 : vector<1x64xf32>
    %38 = arith.mulf %29, %29 : vector<6x64xf32>
    %cst_22 = arith.constant dense<0.000000e+00> : vector<64xf32>
    %39 = vector.multi_reduction <add>, %38, %cst_22 [0] : vector<6x64xf32> to vector<64xf32>
    %40 = vector.shape_cast %39 : vector<64xf32> to vector<1x64xf32>
    %41 = arith.addf %34, %40 : vector<1x64xf32>
    %cst_23 = arith.constant 0.0833333358 : f32
    %42 = vector.broadcast %cst_23 : f32 to vector<1x64xf32>
    %43 = arith.mulf %37, %42 : vector<1x64xf32>
    %cst_24 = arith.constant 0.0833333358 : f32
    %44 = vector.broadcast %cst_24 : f32 to vector<1x64xf32>
    %45 = arith.mulf %41, %44 : vector<1x64xf32>
    %46 = arith.mulf %43, %43 : vector<1x64xf32>
    %47 = arith.subf %45, %46 : vector<1x64xf32>
    %cst_25 = arith.constant 9.99999974E-6 : f32
    %48 = vector.broadcast %cst_25 : f32 to vector<1x64xf32>
    %49 = arith.addf %47, %48 : vector<1x64xf32>
    %50 = math.rsqrt %49 : vector<1x64xf32>
    %51 = arith.mulf %50, %6 : vector<1x64xf32>
    %52 = arith.mulf %43, %51 : vector<1x64xf32>
    %53 = arith.subf %7, %52 : vector<1x64xf32>
    %54 = vector.broadcast %51 : vector<1x64xf32> to vector<6x64xf32>
    %55 = arith.mulf %19, %54 : vector<6x64xf32>
    %56 = vector.broadcast %53 : vector<1x64xf32> to vector<6x64xf32>
    %57 = arith.addf %55, %56 : vector<6x64xf32>
    %58 = vector.extract_strided_slice %57 {offsets = [0, 0], sizes = [4, 64], strides = [1, 1]} : vector<6x64xf32> to vector<4x64xf32>
    %59 = vector.extract_strided_slice %57 {offsets = [1, 0], sizes = [4, 64], strides = [1, 1]} : vector<6x64xf32> to vector<4x64xf32>
    %60 = vector.extract_strided_slice %57 {offsets = [2, 0], sizes = [4, 64], strides = [1, 1]} : vector<6x64xf32> to vector<4x64xf32>
    %61 = tpu.concatenate %58, %59, %60 in 1 : vector<4x64xf32>, vector<4x64xf32>, vector<4x64xf32> -> vector<4x192xf32>
    %62 = arith.truncf %61 : vector<4x192xf32> to vector<4x192xbf16>
    %cst_26 = arith.constant dense<0.000000e+00> : vector<4x64xf32>
    %63 = tpu.matmul %62, %8, %cst_26 {dimension_numbers = #tpu.dot_dimension_numbers<[1], [0], [0], [1], [0, 0, 1, 1], [], []>} : vector<4x192xbf16>, vector<192x64xbf16>, vector<4x64xf32> -> vector<4x64xf32>
    %64 = vector.broadcast %9 : vector<1x64xf32> to vector<4x64xf32>
    %65 = arith.addf %63, %64 : vector<4x64xf32>
    %cst_27 = arith.constant 0.000000e+00 : f32
    %66 = vector.broadcast %cst_27 : f32 to vector<4x64xf32>
    %67 = arith.maximumf %65, %66 : vector<4x64xf32>
    %cst_28 = arith.constant dense<0xFF800000> : vector<64xf32>
    %68 = vector.multi_reduction <maximumf>, %67, %cst_28 [0] : vector<4x64xf32> to vector<64xf32>
    %69 = vector.shape_cast %68 : vector<64xf32> to vector<1x64xf32>
    %70 = vector.broadcast %51 : vector<1x64xf32> to vector<6x64xf32>
    %71 = arith.mulf %29, %70 : vector<6x64xf32>
    %72 = vector.broadcast %53 : vector<1x64xf32> to vector<6x64xf32>
    %73 = arith.addf %71, %72 : vector<6x64xf32>
    %74 = vector.extract_strided_slice %73 {offsets = [0, 0], sizes = [4, 64], strides = [1, 1]} : vector<6x64xf32> to vector<4x64xf32>
    %75 = vector.extract_strided_slice %73 {offsets = [1, 0], sizes = [4, 64], strides = [1, 1]} : vector<6x64xf32> to vector<4x64xf32>
    %76 = vector.extract_strided_slice %73 {offsets = [2, 0], sizes = [4, 64], strides = [1, 1]} : vector<6x64xf32> to vector<4x64xf32>
    %77 = tpu.concatenate %74, %75, %76 in 1 : vector<4x64xf32>, vector<4x64xf32>, vector<4x64xf32> -> vector<4x192xf32>
    %78 = arith.truncf %77 : vector<4x192xf32> to vector<4x192xbf16>
    %cst_29 = arith.constant dense<0.000000e+00> : vector<4x64xf32>
    %79 = tpu.matmul %78, %8, %cst_29 {dimension_numbers = #tpu.dot_dimension_numbers<[1], [0], [0], [1], [0, 0, 1, 1], [], []>} : vector<4x192xbf16>, vector<192x64xbf16>, vector<4x64xf32> -> vector<4x64xf32>
    %80 = vector.broadcast %9 : vector<1x64xf32> to vector<4x64xf32>
    %81 = arith.addf %79, %80 : vector<4x64xf32>
    %cst_30 = arith.constant 0.000000e+00 : f32
    %82 = vector.broadcast %cst_30 : f32 to vector<4x64xf32>
    %83 = arith.maximumf %81, %82 : vector<4x64xf32>
    %cst_31 = arith.constant dense<0xFF800000> : vector<64xf32>
    %84 = vector.multi_reduction <maximumf>, %83, %cst_31 [0] : vector<4x64xf32> to vector<64xf32>
    %85 = vector.shape_cast %84 : vector<64xf32> to vector<1x64xf32>
    %86 = tpu.concatenate %69, %85 in 0 : vector<1x64xf32>, vector<1x64xf32> -> vector<2x64xf32>
    %c0_32 = arith.constant 0 : index
    %c0_33 = arith.constant 0 : index
    %c0_34 = arith.constant 0 : index
    %87 = vector.load %arg1[%c0_32, %c0_33, %c0_34] : memref<2x10x32xf32, #tpu.memory_space<vmem>>, vector<1x10x32xf32>
    %88 = vector.shape_cast %87 : vector<1x10x32xf32> to vector<10x32xf32>
    %c1_35 = arith.constant 1 : index
    %c0_36 = arith.constant 0 : index
    %c0_37 = arith.constant 0 : index
    %89 = vector.load %arg1[%c1_35, %c0_36, %c0_37] : memref<2x10x32xf32, #tpu.memory_space<vmem>>, vector<1x10x32xf32>
    %90 = vector.shape_cast %89 : vector<1x10x32xf32> to vector<10x32xf32>
    %c0_38 = arith.constant 0 : index
    %c0_39 = arith.constant 0 : index
    %91 = vector.load %arg9[%c0_38, %c0_39] : memref<96x64xbf16, #tpu.memory_space<vmem>>, vector<96x64xbf16>
    %c0_40 = arith.constant 0 : index
    %c0_41 = arith.constant 0 : index
    %92 = vector.load %arg10[%c0_40, %c0_41] : memref<1x64xf32, #tpu.memory_space<vmem>>, vector<1x64xf32>
    %c0_42 = arith.constant 0 : index
    %c0_43 = arith.constant 0 : index
    %93 = vector.load %arg11[%c0_42, %c0_43] : memref<1x64xf32, #tpu.memory_space<vmem>>, vector<1x64xf32>
    %c0_44 = arith.constant 0 : index
    %c0_45 = arith.constant 0 : index
    %94 = vector.load %arg12[%c0_44, %c0_45] : memref<1x64xf32, #tpu.memory_space<vmem>>, vector<1x64xf32>
    %c0_46 = arith.constant 0 : index
    %c0_47 = arith.constant 0 : index
    %95 = vector.load %arg13[%c0_46, %c0_47] : memref<192x64xbf16, #tpu.memory_space<vmem>>, vector<192x64xbf16>
    %c0_48 = arith.constant 0 : index
    %c0_49 = arith.constant 0 : index
    %96 = vector.load %arg14[%c0_48, %c0_49] : memref<1x64xf32, #tpu.memory_space<vmem>>, vector<1x64xf32>
    %97 = vector.extract_strided_slice %88 {offsets = [0, 0], sizes = [8, 32], strides = [1, 1]} : vector<10x32xf32> to vector<8x32xf32>
    %98 = vector.extract_strided_slice %88 {offsets = [1, 0], sizes = [8, 32], strides = [1, 1]} : vector<10x32xf32> to vector<8x32xf32>
    %99 = vector.extract_strided_slice %88 {offsets = [2, 0], sizes = [8, 32], strides = [1, 1]} : vector<10x32xf32> to vector<8x32xf32>
    %100 = tpu.concatenate %97, %98, %99 in 1 : vector<8x32xf32>, vector<8x32xf32>, vector<8x32xf32> -> vector<8x96xf32>
    %101 = arith.truncf %100 : vector<8x96xf32> to vector<8x96xbf16>
    %cst_50 = arith.constant dense<0.000000e+00> : vector<8x64xf32>
    %102 = tpu.matmul %101, %91, %cst_50 {dimension_numbers = #tpu.dot_dimension_numbers<[1], [0], [0], [1], [0, 0, 1, 1], [], []>} : vector<8x96xbf16>, vector<96x64xbf16>, vector<8x64xf32> -> vector<8x64xf32>
    %103 = vector.broadcast %92 : vector<1x64xf32> to vector<8x64xf32>
    %104 = arith.addf %102, %103 : vector<8x64xf32>
    %cst_51 = arith.constant 0.000000e+00 : f32
    %105 = vector.broadcast %cst_51 : f32 to vector<8x64xf32>
    %106 = arith.maximumf %104, %105 : vector<8x64xf32>
    %107 = vector.extract_strided_slice %90 {offsets = [0, 0], sizes = [8, 32], strides = [1, 1]} : vector<10x32xf32> to vector<8x32xf32>
    %108 = vector.extract_strided_slice %90 {offsets = [1, 0], sizes = [8, 32], strides = [1, 1]} : vector<10x32xf32> to vector<8x32xf32>
    %109 = vector.extract_strided_slice %90 {offsets = [2, 0], sizes = [8, 32], strides = [1, 1]} : vector<10x32xf32> to vector<8x32xf32>
    %110 = tpu.concatenate %107, %108, %109 in 1 : vector<8x32xf32>, vector<8x32xf32>, vector<8x32xf32> -> vector<8x96xf32>
    %111 = arith.truncf %110 : vector<8x96xf32> to vector<8x96xbf16>
    %cst_52 = arith.constant dense<0.000000e+00> : vector<8x64xf32>
    %112 = tpu.matmul %111, %91, %cst_52 {dimension_numbers = #tpu.dot_dimension_numbers<[1], [0], [0], [1], [0, 0, 1, 1], [], []>} : vector<8x96xbf16>, vector<96x64xbf16>, vector<8x64xf32> -> vector<8x64xf32>
    %113 = vector.broadcast %92 : vector<1x64xf32> to vector<8x64xf32>
    %114 = arith.addf %112, %113 : vector<8x64xf32>
    %cst_53 = arith.constant 0.000000e+00 : f32
    %115 = vector.broadcast %cst_53 : f32 to vector<8x64xf32>
    %116 = arith.maximumf %114, %115 : vector<8x64xf32>
    %cst_54 = arith.constant dense<0.000000e+00> : vector<64xf32>
    %117 = vector.multi_reduction <add>, %106, %cst_54 [0] : vector<8x64xf32> to vector<64xf32>
    %118 = vector.shape_cast %117 : vector<64xf32> to vector<1x64xf32>
    %119 = arith.mulf %106, %106 : vector<8x64xf32>
    %cst_55 = arith.constant dense<0.000000e+00> : vector<64xf32>
    %120 = vector.multi_reduction <add>, %119, %cst_55 [0] : vector<8x64xf32> to vector<64xf32>
    %121 = vector.shape_cast %120 : vector<64xf32> to vector<1x64xf32>
    %cst_56 = arith.constant dense<0.000000e+00> : vector<64xf32>
    %122 = vector.multi_reduction <add>, %116, %cst_56 [0] : vector<8x64xf32> to vector<64xf32>
    %123 = vector.shape_cast %122 : vector<64xf32> to vector<1x64xf32>
    %124 = arith.addf %118, %123 : vector<1x64xf32>
    %125 = arith.mulf %116, %116 : vector<8x64xf32>
    %cst_57 = arith.constant dense<0.000000e+00> : vector<64xf32>
    %126 = vector.multi_reduction <add>, %125, %cst_57 [0] : vector<8x64xf32> to vector<64xf32>
    %127 = vector.shape_cast %126 : vector<64xf32> to vector<1x64xf32>
    %128 = arith.addf %121, %127 : vector<1x64xf32>
    %cst_58 = arith.constant 6.250000e-02 : f32
    %129 = vector.broadcast %cst_58 : f32 to vector<1x64xf32>
    %130 = arith.mulf %124, %129 : vector<1x64xf32>
    %cst_59 = arith.constant 6.250000e-02 : f32
    %131 = vector.broadcast %cst_59 : f32 to vector<1x64xf32>
    %132 = arith.mulf %128, %131 : vector<1x64xf32>
    %133 = arith.mulf %130, %130 : vector<1x64xf32>
    %134 = arith.subf %132, %133 : vector<1x64xf32>
    %cst_60 = arith.constant 9.99999974E-6 : f32
    %135 = vector.broadcast %cst_60 : f32 to vector<1x64xf32>
    %136 = arith.addf %134, %135 : vector<1x64xf32>
    %137 = math.rsqrt %136 : vector<1x64xf32>
    %138 = arith.mulf %137, %93 : vector<1x64xf32>
    %139 = arith.mulf %130, %138 : vector<1x64xf32>
    %140 = arith.subf %94, %139 : vector<1x64xf32>
    %141 = vector.broadcast %138 : vector<1x64xf32> to vector<8x64xf32>
    %142 = arith.mulf %106, %141 : vector<8x64xf32>
    %143 = vector.broadcast %140 : vector<1x64xf32> to vector<8x64xf32>
    %144 = arith.addf %142, %143 : vector<8x64xf32>
    %145 = vector.extract_strided_slice %144 {offsets = [0, 0], sizes = [6, 64], strides = [1, 1]} : vector<8x64xf32> to vector<6x64xf32>
    %146 = vector.extract_strided_slice %144 {offsets = [1, 0], sizes = [6, 64], strides = [1, 1]} : vector<8x64xf32> to vector<6x64xf32>
    %147 = vector.extract_strided_slice %144 {offsets = [2, 0], sizes = [6, 64], strides = [1, 1]} : vector<8x64xf32> to vector<6x64xf32>
    %148 = tpu.concatenate %145, %146, %147 in 1 : vector<6x64xf32>, vector<6x64xf32>, vector<6x64xf32> -> vector<6x192xf32>
    %149 = arith.truncf %148 : vector<6x192xf32> to vector<6x192xbf16>
    %cst_61 = arith.constant dense<0.000000e+00> : vector<6x64xf32>
    %150 = tpu.matmul %149, %95, %cst_61 {dimension_numbers = #tpu.dot_dimension_numbers<[1], [0], [0], [1], [0, 0, 1, 1], [], []>} : vector<6x192xbf16>, vector<192x64xbf16>, vector<6x64xf32> -> vector<6x64xf32>
    %151 = vector.broadcast %96 : vector<1x64xf32> to vector<6x64xf32>
    %152 = arith.addf %150, %151 : vector<6x64xf32>
    %cst_62 = arith.constant 0.000000e+00 : f32
    %153 = vector.broadcast %cst_62 : f32 to vector<6x64xf32>
    %154 = arith.maximumf %152, %153 : vector<6x64xf32>
    %cst_63 = arith.constant dense<0xFF800000> : vector<64xf32>
    %155 = vector.multi_reduction <maximumf>, %154, %cst_63 [0] : vector<6x64xf32> to vector<64xf32>
    %156 = vector.shape_cast %155 : vector<64xf32> to vector<1x64xf32>
    %157 = vector.broadcast %138 : vector<1x64xf32> to vector<8x64xf32>
    %158 = arith.mulf %116, %157 : vector<8x64xf32>
    %159 = vector.broadcast %140 : vector<1x64xf32> to vector<8x64xf32>
    %160 = arith.addf %158, %159 : vector<8x64xf32>
    %161 = vector.extract_strided_slice %160 {offsets = [0, 0], sizes = [6, 64], strides = [1, 1]} : vector<8x64xf32> to vector<6x64xf32>
    %162 = vector.extract_strided_slice %160 {offsets = [1, 0], sizes = [6, 64], strides = [1, 1]} : vector<8x64xf32> to vector<6x64xf32>
    %163 = vector.extract_strided_slice %160 {offsets = [2, 0], sizes = [6, 64], strides = [1, 1]} : vector<8x64xf32> to vector<6x64xf32>
    %164 = tpu.concatenate %161, %162, %163 in 1 : vector<6x64xf32>, vector<6x64xf32>, vector<6x64xf32> -> vector<6x192xf32>
    %165 = arith.truncf %164 : vector<6x192xf32> to vector<6x192xbf16>
    %cst_64 = arith.constant dense<0.000000e+00> : vector<6x64xf32>
    %166 = tpu.matmul %165, %95, %cst_64 {dimension_numbers = #tpu.dot_dimension_numbers<[1], [0], [0], [1], [0, 0, 1, 1], [], []>} : vector<6x192xbf16>, vector<192x64xbf16>, vector<6x64xf32> -> vector<6x64xf32>
    %167 = vector.broadcast %96 : vector<1x64xf32> to vector<6x64xf32>
    %168 = arith.addf %166, %167 : vector<6x64xf32>
    %cst_65 = arith.constant 0.000000e+00 : f32
    %169 = vector.broadcast %cst_65 : f32 to vector<6x64xf32>
    %170 = arith.maximumf %168, %169 : vector<6x64xf32>
    %cst_66 = arith.constant dense<0xFF800000> : vector<64xf32>
    %171 = vector.multi_reduction <maximumf>, %170, %cst_66 [0] : vector<6x64xf32> to vector<64xf32>
    %172 = vector.shape_cast %171 : vector<64xf32> to vector<1x64xf32>
    %173 = tpu.concatenate %156, %172 in 0 : vector<1x64xf32>, vector<1x64xf32> -> vector<2x64xf32>
    %c0_67 = arith.constant 0 : index
    %c0_68 = arith.constant 0 : index
    %174 = vector.load %arg2[%c0_67, %c0_68] : memref<2x8xf32, #tpu.memory_space<vmem>>, vector<2x8xf32>
    %c0_69 = arith.constant 0 : index
    %c0_70 = arith.constant 0 : index
    %175 = vector.load %arg15[%c0_69, %c0_70] : memref<8x64xf32, #tpu.memory_space<vmem>>, vector<8x64xf32>
    %cst_71 = arith.constant dense<0.000000e+00> : vector<2x64xf32>
    %176 = tpu.matmul %174, %175, %cst_71 {dimension_numbers = #tpu.dot_dimension_numbers<[1], [0], [0], [1], [0, 0, 1, 1], [], []>} : vector<2x8xf32>, vector<8x64xf32>, vector<2x64xf32> -> vector<2x64xf32>
    %c0_72 = arith.constant 0 : index
    %c0_73 = arith.constant 0 : index
    %177 = vector.load %arg16[%c0_72, %c0_73] : memref<1x64xf32, #tpu.memory_space<vmem>>, vector<1x64xf32>
    %178 = vector.broadcast %177 : vector<1x64xf32> to vector<2x64xf32>
    %179 = arith.addf %176, %178 : vector<2x64xf32>
    %c0_74 = arith.constant 0 : index
    %c0_75 = arith.constant 0 : index
    %180 = vector.load %arg17[%c0_74, %c0_75] : memref<1x64xf32, #tpu.memory_space<vmem>>, vector<1x64xf32>
    %181 = vector.broadcast %180 : vector<1x64xf32> to vector<2x64xf32>
    %182 = arith.mulf %86, %181 : vector<2x64xf32>
    %c0_76 = arith.constant 0 : index
    %c0_77 = arith.constant 0 : index
    %183 = vector.load %arg18[%c0_76, %c0_77] : memref<1x64xf32, #tpu.memory_space<vmem>>, vector<1x64xf32>
    %184 = vector.broadcast %183 : vector<1x64xf32> to vector<2x64xf32>
    %185 = arith.mulf %173, %184 : vector<2x64xf32>
    %186 = arith.addf %182, %185 : vector<2x64xf32>
    %c0_78 = arith.constant 0 : index
    %c0_79 = arith.constant 0 : index
    %187 = vector.load %arg19[%c0_78, %c0_79] : memref<1x64xf32, #tpu.memory_space<vmem>>, vector<1x64xf32>
    %188 = vector.broadcast %187 : vector<1x64xf32> to vector<2x64xf32>
    %189 = arith.mulf %179, %188 : vector<2x64xf32>
    %190 = arith.addf %186, %189 : vector<2x64xf32>
    %cst_80 = arith.constant dense<0.000000e+00> : vector<2xf32>
    %191 = vector.multi_reduction <add>, %190, %cst_80 [1] : vector<2x64xf32> to vector<2xf32>
    %192 = vector.shape_cast %191 : vector<2xf32> to vector<2x1xf32>
    %c0_81 = arith.constant 0 : index
    %c0_82 = arith.constant 0 : index
    %193 = vector.load %arg20[%c0_81, %c0_82] : memref<1x1xf32, #tpu.memory_space<vmem>>, vector<1x1xf32>
    %194 = vector.broadcast %193 : vector<1x1xf32> to vector<2x1xf32>
    %195 = arith.addf %192, %194 : vector<2x1xf32>
    %c0_83 = arith.constant 0 : index
    %c0_84 = arith.constant 0 : index
    %196 = vector.load %arg21[%c0_83, %c0_84] : memref<2x1xf32, #tpu.memory_space<vmem>>, vector<2x1xf32>
    tpu.vector_store %arg21[%c0_83, %c0_84], %195 {strides = array<i32>} : memref<2x1xf32, #tpu.memory_space<vmem>>, vector<2x1xf32>,
    return
  }
}

</mosaic_0001>

<bundles_post_ra>
// kernel: tpu_custom_call.1
= control target key start
LH: loop header
LB: loop body
LE: loop exit
PB: predicated region body
PF: predicated region fallthrough
CT: control target
= control target key end

     0   :  { %v1355_v2 = vmov 0.0   ;;  %vm1356_vm0 = vmmov 0   ;;  %vm123_vm1 = vcmask 261120   ;;  %vm125_vm2 = vcmask 523264   ;;  %s1793_s0 = inlined_call_operand.vmem [shape: f32[2,8,32], index: 0, kind: input, shape index: {}]   ;;  %s1794_s3 = inlined_call_operand.vmem [shape: bf16[96,64], index: 3, kind: input, shape index: {}]   ;;  %s1795_s1 = inlined_call_operand.vmem [shape: f32[2,10,32], index: 1, kind: input, shape index: {}]   ;;  %s1796_s7 = inlined_call_operand.vmem [shape: bf16[192,64], index: 7, kind: input, shape index: {}]   ;;  %s1797_s4 = inlined_call_operand.vmem [shape: f32[1,64], index: 4, kind: input, shape index: {}]   ;;  %s1798_s5 = inlined_call_operand.vmem [shape: f32[1,64], index: 5, kind: input, shape index: {}]   ;;  %s1799_s6 = inlined_call_operand.vmem [shape: f32[1,64], index: 6, kind: input, shape index: {}]   ;;  %s1800_s9 = inlined_call_operand.vmem [shape: bf16[96,64], index: 9, kind: input, shape index: {}]   ;;  %s1801_s13 = inlined_call_operand.vmem [shape: bf16[192,64], index: 13, kind: input, shape index: {}]   ;;  %s1802_s8 = inlined_call_operand.vmem [shape: f32[1,64], index: 8, kind: input, shape index: {}]   ;;  %s1803_s10 = inlined_call_operand.vmem [shape: f32[1,64], index: 10, kind: input, shape index: {}]   ;;  %s1804_s11 = inlined_call_operand.vmem [shape: f32[1,64], index: 11, kind: input, shape index: {}]   ;;  %s1805_s12 = inlined_call_operand.vmem [shape: f32[1,64], index: 12, kind: input, shape index: {}]   ;;  %s1806_s15 = inlined_call_operand.vmem [shape: f32[8,64], index: 15, kind: input, shape index: {}]   ;;  %s1807_s2 = inlined_call_operand.vmem [shape: f32[2,8], index: 2, kind: input, shape index: {}]   ;;  %s1808_s20 = inlined_call_operand.<no memory space> [shape: f32[1,1], index: 20, kind: input, shape index: {}]   ;;  %s1809_s14 = inlined_call_operand.vmem [shape: f32[1,64], index: 14, kind: input, shape index: {}]   ;;  %s1810_s16 = inlined_call_operand.vmem [shape: f32[1,64], index: 16, kind: input, shape index: {}]   ;;  %s1811_s19 = inlined_call_operand.vmem [shape: f32[1,64], index: 19, kind: input, shape index: {}]   ;;  %s1812_s17 = inlined_call_operand.vmem [shape: f32[1,64], index: 17, kind: input, shape index: {}]   ;;  %s1813_s18 = inlined_call_operand.vmem [shape: f32[1,64], index: 18, kind: input, shape index: {}]   ;;  %s1814_s21 = inlined_call_operand.vmem [shape: f32[2,1], index: 21, kind: output, shape index: {}]  }
   0x1   :  { %1819 = sst [smem:[#allocation3_spill]] %s1793_s0  ;;  %1211 = vmatprep.subr.bf16.mxu0 %v1355_v2  ;;  %1227 = vmatprep.subr.bf16.mxu1 %v1355_v2  ;;  %vm170_vm3 = vcmask 785408   ;;  %vm577_vm4 = vcmask 1046528   ;;  %vm584_vm5 = vcmask 1045504   ;;  %v1359_v44 = vmov 0  }
   0x2   :  { %1820 = sst [smem:[#allocation4_spill]] %s1794_s3  ;;  %s1825_s26 = sld [smem:[#allocation3_spill]]  ;;  %1223 = vmatprep.mubr.msk.bf16.mxu0 %vm1356_vm0, %v1355_v2  ;;  %1239 = vmatprep.mubr.msk.bf16.mxu1 %vm1356_vm0, %v1355_v2  ;;  %vm271_vm6 = vcmask 521216   ;;  %vm457_vm7 = vcmask 519168   ;;  %vm528_vm8 = vcmask 1040384   ;;  %vm1006_vm9 = vcmask 64512  }
   0x3   :  { %1821 = sst [smem:[#allocation5_spill]] %s1795_s1  ;;  %s1826_s0 = sld [smem:[#allocation4_spill]]  ;;  %vm1106_vm10 = vcmask 517120   ;;  %vm1118_vm11 = vcmask 1024  }
   0x4   :  { %1822 = sst [smem:[#allocation6_spill]] %s1796_s7  ;;  %s1358_s3 = smov 64  }
   0x5   :  { %1823 = sst [smem:[#allocation7_spill]] %s1797_s4  ;;  %s1828_s27 = sld [smem:[#allocation6_spill]] }
   0x6   :  { %1824 = sst [smem:[#allocation8_spill]] %s1798_s5  ;;  %s1357_s5 = smov 32  }
   0x7   :  { %s1829_s25 = sld [smem:[#allocation7_spill]]  ;;  %s1830_s28 = sld [smem:[#allocation8_spill]] }
   0x8   :  { %v71_v0 = vld [vmem:[%s1825_s26] sm:$0xff]  ;;  %v1124_v1 = vld [vmem:[%s1825_s26 + $0x8] sm:$0xff] }
   0x9   :  { %v115_v3 = vrot.slane %v71_v0, 1  ;;  %v216_v4 = vrot.slane %v1124_v1, 1  ;;  %v119_v5 = vrot.slane %v71_v0, 2  ;;  %v220_v6 = vrot.slane %v1124_v1, 2  ;;  %v1315_v7 = vld [vmem:[%s1826_s0] sm:$0xff]   ;;  %v1316_v9 = vld [vmem:[%s1826_s0 + $0x8] sm:$0xff]  }
   0xa   :  { %1212 = vmatpush3.bf16.msra.mxu0 %v1315_v7  ;;  %1228 = vmatpush3.bf16.msra.mxu1 %v1315_v7  ;;  %v1317_v11 = vld [vmem:[%s1826_s0 + $0x10] sm:$0xff]   ;;  %v1318_v12 = vld [vmem:[%s1826_s0 + $0x18] sm:$0xff]   ;;  %v1319_v13 = vld [vmem:[%s1826_s0 + $0x20] sm:$0xff]  }
   0xb   :  { %v1285_v8 = vpack.i.bf16 %v216_v4, %v115_v3  ;;  %v1290_v10 = vpack.i.bf16 %v220_v6, %v119_v5  ;;  %1213 = vmatprep.subr.bf16.mxu0 %v1355_v2  ;;  %1229 = vmatprep.subr.bf16.mxu1 %v1355_v2  ;;  %v1320_v14 = vld [vmem:[%s1826_s0 + $0x28] sm:$0xff]   ;;  %s1827_s0 = sld [smem:[#allocation5_spill]]  ;;  %v1321_v41 = vld [vmem:[%s1828_s27] sm:$0xff]   ;;  %v1323_v48 = vld [vmem:[%s1828_s27 + $0x10] sm:$0xff]  }
   0xc   :  { %v1322_v46 = vld [vmem:[%s1828_s27 + $0x8] sm:$0xff]   ;;  %v1324_v49 = vld [vmem:[%s1828_s27 + $0x18] sm:$0xff]   ;;  %v1325_v50 = vld [vmem:[%s1828_s27 + $0x20] sm:$0xff]  }
   0xd   :  { %1286 = vrot.lane.b32.xlu0 %v1285_v8, %s1357_s5  ;;  %v1326_v51 = vld [vmem:[%s1828_s27 + $0x28] sm:$0xff]   ;;  %v1327_v52 = vld [vmem:[%s1828_s27 + $0x30] sm:$0xff]   ;;  %v1328_v53 = vld [vmem:[%s1828_s27 + $0x38] sm:$0xff]  }
   0xe   :  { %1214 = vmatpush3.bf16.msra.mxu0 %v1316_v9  ;;  %1230 = vmatpush3.bf16.msra.mxu1 %v1316_v9  ;;  %v1329_v54 = vld [vmem:[%s1828_s27 + $0x40] sm:$0xff]   ;;  %v1330_v55 = vld [vmem:[%s1828_s27 + $0x48] sm:$0xff]   ;;  %v1331_v56 = vld [vmem:[%s1828_s27 + $0x50] sm:$0xff]  }
   0xf   :  { %1215 = vmatprep.subr.bf16.mxu0 %v1355_v2  ;;  %1231 = vmatprep.subr.bf16.mxu1 %v1355_v2  ;;  %v1125_v57 = vld [vmem:[%s1829_s25] ss:$0 sm:$0xff] }
  0x11   :  { %1291 = vrot.lane.b32.xlu0 %v1290_v10, %s1358_s3  ;;  %v1521_v27 = vld [vmem:[%s1827_s0] sm:$0xff]  ;;  %v531_v28 = vld [vmem:[%s1827_s0 + $0x8] sm:$0x3]  ;;  %v1529_v29 = vld [vmem:[%s1827_s0 + $0x10] sm:$0xff] }
  0x12   :  { %1216 = vmatpush3.bf16.msra.mxu0 %v1317_v11  ;;  %1232 = vmatpush3.bf16.msra.mxu1 %v1317_v11  ;;  %v1150_v30 = vld [vmem:[%s1827_s0 + $0x18] sm:$0x3]  ;;  %v578_v31 = vrot.slane %v1521_v27, 1  ;;  %v579_v32 = vrot.slane %v531_v28, 1  ;;  %v682_v33 = vrot.slane %v1529_v29, 1  ;;  %v585_v36 = vrot.slane %v1521_v27, 2 }
  0x13   :  { %1217 = vmatprep.subr.bf16.mxu0 %v1355_v2  ;;  %1233 = vmatprep.subr.bf16.mxu1 %v1355_v2  ;;  %v683_v34 = vrot.slane %v1150_v30, 1  ;;  %v586_v37 = vrot.slane %v531_v28, 2  ;;  %v688_v39 = vrot.slane %v1529_v29, 2  ;;  %v689_v40 = vrot.slane %v1150_v30, 2 }
  0x14   :  { %v1536_v35 = vsel %vm577_vm4, %v578_v31, %v579_v32 }
  0x15   :  { %v1539_v38 = vsel %vm577_vm4, %v682_v33, %v683_v34  ;;  %v587_v43 = vsel %vm584_vm5, %v585_v36, %v586_v37  ;;  %v690_v45 = vsel %vm584_vm5, %v688_v39, %v689_v40 }
  0x16   :  { %1218 = vmatpush3.bf16.msra.mxu0 %v1318_v12  ;;  %1234 = vmatpush3.bf16.msra.mxu1 %v1318_v12  ;;  %v1300_v42 = vpack.i.bf16 %v1539_v38, %v1536_v35  ;;  %v1305_v47 = vpack.i.bf16 %v690_v45, %v587_v43  ;;  %v1334_v35 = vld [vmem:[%s1800_s9 + $0x8] sm:$0xff]   ;;  %v1335_v38 = vld [vmem:[%s1800_s9 + $0x10] sm:$0xff]  }
  0x17   :  { %1219 = vmatprep.subr.bf16.mxu0 %v1355_v2  ;;  %1235 = vmatprep.subr.bf16.mxu1 %v1355_v2 }
  0x18   :  { %1306 = vrot.lane.b32.xlu0 %v1305_v47, %s1358_s3 }
  0x1a   :  { %1220 = vmatpush3.bf16.msra.mxu0 %v1319_v13  ;;  %1236 = vmatpush3.bf16.msra.mxu1 %v1319_v13 }
  0x1b   :  { %1221 = vmatprep.subr.bf16.mxu0 %v1355_v2  ;;  %1237 = vmatprep.subr.bf16.mxu1 %v1355_v2 }
  0x1e   :  { %1222 = vmatpush3.bf16.msra.mxu0 %v1320_v14  ;;  %1238 = vmatpush3.bf16.msra.mxu1 %v1320_v14 }
  0x1f   :  { %416 = vmatprep.subr.bf16.mxu0 %v1359_v44  ;;  %480 = vmatprep.subr.bf16.mxu1 %v1359_v44 }
  0x7f   :  { %v1287_v15 = vpop.permute.xlu0 %1286 }
  0x80   :  { %v1289_v16 = vunpack.i.h.bf16 %v1287_v15  ;;  %v1288_v17 = vunpack.i.l.bf16 %v1287_v15 }
  0x82   :  { %v224_v21 = vsel %vm123_vm1, %v1124_v1, %v1289_v16  ;;  %v124_v22 = vsel %vm123_vm1, %v71_v0, %v1288_v17 }
  0x83   :  { %v1292_v18 = vpop.permute.xlu0 %1291 }
  0x84   :  { %v1294_v19 = vunpack.i.h.bf16 %v1292_v18  ;;  %v1293_v20 = vunpack.i.l.bf16 %v1292_v18 }
  0x86   :  { %v126_v23 = vsel %vm125_vm2, %v124_v22, %v1293_v20  ;;  %v225_v24 = vsel %vm125_vm2, %v224_v21, %v1294_v19 }
  0x87   :  { %v127_v25 = vpack.c.bf16 %v126_v23, %v126_v23  ;;  %v226_v26 = vpack.c.bf16 %v225_v24, %v225_v24 }
  0x89   :  { %1224 = vmatmul.mubr.msk.bf16.vlgmr.msra.gmra.mrb[0].mxu0 %vm170_vm3, %v127_v25  ;;  %1240 = vmatmul.mubr.msk.bf16.vlgmr.msra.gmra.mrb[0].mxu1 %vm170_vm3, %v226_v26 }
  0x8a   :  { %417 = vmatpush1.bf16.msra.mxu0 %v1321_v41  ;;  %481 = vmatpush1.bf16.msra.mxu1 %v1321_v41 }
  0x8b   :  { %418 = vmatprep.subr.bf16.mxu0 %v1359_v44  ;;  %482 = vmatprep.subr.bf16.mxu1 %v1359_v44 }
  0x8e   :  { %419 = vmatpush1.bf16.msra.mxu0 %v1322_v46  ;;  %483 = vmatpush1.bf16.msra.mxu1 %v1322_v46 }
  0x8f   :  { %420 = vmatprep.subr.bf16.mxu0 %v1359_v44  ;;  %484 = vmatprep.subr.bf16.mxu1 %v1359_v44 }
  0x92   :  { %421 = vmatpush1.bf16.msra.mxu0 %v1323_v48  ;;  %485 = vmatpush1.bf16.msra.mxu1 %v1323_v48 }
  0x93   :  { %422 = vmatprep.subr.bf16.mxu0 %v1359_v44  ;;  %486 = vmatprep.subr.bf16.mxu1 %v1359_v44 }
  0x96   :  { %423 = vmatpush1.bf16.msra.mxu0 %v1324_v49  ;;  %487 = vmatpush1.bf16.msra.mxu1 %v1324_v49 }
  0x97   :  { %424 = vmatprep.subr.bf16.mxu0 %v1359_v44  ;;  %488 = vmatprep.subr.bf16.mxu1 %v1359_v44 }
  0x9a   :  { %425 = vmatpush1.bf16.msra.mxu0 %v1325_v50  ;;  %489 = vmatpush1.bf16.msra.mxu1 %v1325_v50  ;;  %v313_v50 = vlaneseq }
  0x9b   :  { %426 = vmatprep.subr.bf16.mxu0 %v1359_v44  ;;  %490 = vmatprep.subr.bf16.mxu1 %v1359_v44 }
  0x9e   :  { %427 = vmatpush1.bf16.msra.mxu0 %v1326_v51  ;;  %491 = vmatpush1.bf16.msra.mxu1 %v1326_v51  ;;  %v314_v51 = vshrl.u32 %v313_v50, 7 }
  0x9f   :  { %428 = vmatprep.subr.bf16.mxu0 %v1359_v44  ;;  %492 = vmatprep.subr.bf16.mxu1 %v1359_v44 }
  0xa2   :  { %429 = vmatpush1.bf16.msra.mxu0 %v1327_v52  ;;  %493 = vmatpush1.bf16.msra.mxu1 %v1327_v52  ;;  %v87_v52 = vld [vmem:[%s1830_s28] sm:$0x1] }
  0xa3   :  { %430 = vmatprep.subr.bf16.mxu0 %v1359_v44  ;;  %494 = vmatprep.subr.bf16.mxu1 %v1359_v44 }
  0xa6   :  { %431 = vmatpush1.bf16.msra.mxu0 %v1328_v53  ;;  %495 = vmatpush1.bf16.msra.mxu1 %v1328_v53  ;;  %v1612_v53 = vsub.s32 0, %v314_v51 }
  0xa7   :  { %432 = vmatprep.subr.bf16.mxu0 %v1359_v44  ;;  %496 = vmatprep.subr.bf16.mxu1 %v1359_v44 }
  0xaa   :  { %433 = vmatpush1.bf16.msra.mxu0 %v1329_v54  ;;  %497 = vmatpush1.bf16.msra.mxu1 %v1329_v54 }
  0xab   :  { %434 = vmatprep.subr.bf16.mxu0 %v1359_v44  ;;  %498 = vmatprep.subr.bf16.mxu1 %v1359_v44 }
  0xae   :  { %435 = vmatpush1.bf16.msra.mxu0 %v1330_v55  ;;  %499 = vmatpush1.bf16.msra.mxu1 %v1330_v55 }
  0xaf   :  { %436 = vmatprep.subr.bf16.mxu0 %v1359_v44  ;;  %500 = vmatprep.subr.bf16.mxu1 %v1359_v44 }
  0xb2   :  { %437 = vmatpush1.bf16.msra.mxu0 %v1331_v56  ;;  %501 = vmatpush1.bf16.msra.mxu1 %v1331_v56  ;;  %v88_v56 = vld [vmem:[%s1799_s6] sm:$0x1] }
  0xb3   :  { %438 = vmatprep.subr.bf16.mxu0 %v1359_v44  ;;  %502 = vmatprep.subr.bf16.mxu1 %v1359_v44 }
 0x15c   :  { %v208_v58 = vpop.f32.mrb[0].mxu0  ;;  %v264_v59 = vpop.f32.mrb[0].mxu1 }
 0x15d   :  { %v209_v60 = vadd.f32 %v1125_v57, %v208_v58  ;;  %v265_v61 = vadd.f32 %v1125_v57, %v264_v59  ;;  %v1225_v62 = vpop.f32.mrb[1].mxu0  ;;  %v1241_v63 = vpop.f32.mrb[1].mxu1  ;;  %v1332_v57 = vld [vmem:[%s1828_s27 + $0x58] sm:$0xff]  }
 0x15e   :  { %v211_v0 = vpop.f32.mrb[2].mxu0  ;;  %v267_v1 = vpop.f32.mrb[2].mxu1  ;;  %439 = vmatpush1.bf16.msra.mxu0 %v1332_v57  ;;  %503 = vmatpush1.bf16.msra.mxu1 %v1332_v57 }
 0x15f   :  { %v214_v3 = vmax.f32 %v209_v60, 0.0  ;;  %v270_v4 = vmax.f32 %v265_v61, 0.0  ;;  %v1226_v5 = vpop.f32.mrb[3].mxu0  ;;  %v1242_v6 = vpop.f32.mrb[3].mxu1  ;;  %1243 = vmatprep.subr.bf16.mxu0 %v1355_v2  ;;  %1259 = vmatprep.subr.bf16.mxu1 %v1355_v2 }
 0x161   :  { %v272_v7 = vsel %vm271_vm6, %v214_v3, 0.0  ;;  %v279_v8 = vmul.f32 %v214_v3, %v214_v3  ;;  %v287_v9 = vsel %vm271_vm6, %v270_v4, 0.0  ;;  %v295_v10 = vmul.f32 %v270_v4, %v270_v4 }
 0x162   :  { %v273_v11 = vrot.slane %v272_v7, 4  ;;  %v288_v12 = vrot.slane %v287_v9, 4 }
 0x163   :  { %v280_v13 = vsel %vm271_vm6, %v279_v8, 0.0  ;;  %v296_v14 = vsel %vm271_vm6, %v295_v10, 0.0 }
 0x164   :  { %v274_v15 = vadd.f32 %v273_v11, %v272_v7  ;;  %v281_v16 = vrot.slane %v280_v13, 4  ;;  %v289_v17 = vadd.f32 %v288_v12, %v287_v9  ;;  %v297_v18 = vrot.slane %v296_v14, 4 }
 0x166   :  { %v275_v19 = vrot.slane %v274_v15, 2  ;;  %v282_v20 = vadd.f32 %v281_v16, %v280_v13  ;;  %v290_v21 = vrot.slane %v289_v17, 2  ;;  %v298_v22 = vadd.f32 %v297_v18, %v296_v14  ;;  %v1336_v18 = vld [vmem:[%s1800_s9 + $0x18] sm:$0xff]  }
 0x168   :  { %v276_v23 = vadd.f32 %v275_v19, %v274_v15  ;;  %v283_v24 = vrot.slane %v282_v20, 2  ;;  %v291_v25 = vadd.f32 %v290_v21, %v289_v17  ;;  %v299_v26 = vrot.slane %v298_v22, 2  ;;  %v1333_v15 = vld [vmem:[%s1800_s9] sm:$0xff]   ;;  %v1307_v21 = vpop.permute.xlu0 %1306 }
 0x16a   :  { %v277_v28 = vrot.slane %v276_v23, 1  ;;  %v284_v30 = vadd.f32 %v283_v24, %v282_v20  ;;  %v292_v31 = vrot.slane %v291_v25, 1  ;;  %v300_v32 = vadd.f32 %v299_v26, %v298_v22  ;;  %v1337_v22 = vld [vmem:[%s1800_s9 + $0x20] sm:$0xff]  }
 0x16b   :  { %v1308_v24 = vunpack.i.l.bf16 %v1307_v21 }
 0x16c   :  { %v278_v33 = vadd.f32 %v277_v28, %v276_v23  ;;  %v285_v34 = vrot.slane %v284_v30, 1  ;;  %v293_v36 = vadd.f32 %v292_v31, %v291_v25  ;;  %v301_v37 = vrot.slane %v300_v32, 1  ;;  %v1338_v31 = vld [vmem:[%s1800_s9 + $0x28] sm:$0xff]  }
 0x16d   :  { %v1309_v23 = vunpack.i.h.bf16 %v1307_v21 }
 0x16e   :  { %v286_v39 = vadd.f32 %v285_v34, %v284_v30  ;;  %v294_v40 = vadd.f32 %v293_v36, %v278_v33  ;;  %v302_v41 = vadd.f32 %v301_v37, %v300_v32  ;;  %v1341_v34 = vld [vmem:[%s1801_s13 + $0x10] sm:$0xff]   ;;  %v1342_v36 = vld [vmem:[%s1801_s13 + $0x18] sm:$0xff]   ;;  %v1343_v37 = vld [vmem:[%s1801_s13 + $0x20] sm:$0xff]  }
 0x170   :  { %v303_v43 = vadd.f32 %v302_v41, %v286_v39  ;;  %v304_v45 = vmul.f32 0.083333336, %v294_v40  ;;  %v1344_v39 = vld [vmem:[%s1801_s13 + $0x28] sm:$0xff]   ;;  %v1345_v40 = vld [vmem:[%s1801_s13 + $0x30] sm:$0xff]   ;;  %v1346_v41 = vld [vmem:[%s1801_s13 + $0x38] sm:$0xff]  }
 0x172   :  { %v305_v46 = vmul.f32 0.083333336, %v303_v43  ;;  %v306_v47 = vmul.f32 %v304_v45, %v304_v45  ;;  %v1347_v43 = vld [vmem:[%s1801_s13 + $0x40] sm:$0xff]  }
 0x174   :  { %v307_v48 = vsub.f32 %v305_v46, %v306_v47  ;;  %v1349_v46 = vld [vmem:[%s1801_s13 + $0x50] sm:$0xff]   ;;  %v1134_v47 = vld [vmem:[%s1802_s8] ss:$0 sm:$0xff] }
 0x176   :  { %v308_v49 = vadd.f32 1e-05, %v307_v48 }
 0x178   :  { %1351 = vrsqrt.f32 %v308_v49 }
 0x182   :  { %v1352_v54 = vpop.eup %1351 }
 0x183   :  { %v310_v55 = vmul.f32 %v1352_v54, %v87_v52 }
 0x185   :  { %v311_v58 = vmul.f32 %v310_v55, %v304_v45  ;;  %v316_v59 = vrot.slane %v310_v55, %v1612_v53  ;;  %v1348_v45 = vld [vmem:[%s1801_s13 + $0x48] sm:$0xff]  }
 0x187   :  { %v312_v60 = vsub.f32 %v88_v56, %v311_v58  ;;  %v317_v61 = vmul.f32 %v316_v59, %v214_v3  ;;  %v465_v62 = vmul.f32 %v316_v59, %v270_v4 }
 0x189   :  { %v322_v63 = vrot.slane %v312_v60, %v1612_v53 }
 0x18b   :  { %v324_v0 = vadd.f32 %v322_v63, %v317_v61  ;;  %v466_v1 = vadd.f32 %v465_v62, %v322_v63 }
 0x18d   :  { %v330_v5 = vrot.slane %v324_v0, 2  ;;  %v472_v6 = vrot.slane %v466_v1, 2  ;;  %v326_v7 = vrot.slane %v324_v0, 1  ;;  %v468_v8 = vrot.slane %v466_v1, 1 }
 0x18f   :  { %v334_v9 = vpack.c.bf16 %v330_v5, %v330_v5  ;;  %v476_v10 = vpack.c.bf16 %v472_v6, %v472_v6  ;;  %v1295_v11 = vpack.i.bf16 %v468_v8, %v326_v7 }
 0x191   :  { %1147 = vmatprep.mubr.msk.bf16.mxu0 %vm125_vm2, %v334_v9  ;;  %1148 = vmatprep.mubr.msk.bf16.mxu1 %vm125_vm2, %v476_v10 }
 0x192   :  { %1296 = vrot.lane.b32.xlu1 %v1295_v11, %s1358_s3 }
 0x196   :  { %1301 = vrot.lane.b32.xlu1 %v1300_v42, %s1357_s5 }
 0x204   :  { %v1297_v3 = vpop.permute.xlu1 %1296 }
 0x205   :  { %v1299_v4 = vunpack.i.h.bf16 %v1297_v3  ;;  %v1298_v12 = vunpack.i.l.bf16 %v1297_v3 }
 0x207   :  { %v474_v13 = vsel %vm125_vm2, %v466_v1, %v1299_v4  ;;  %v332_v14 = vsel %vm125_vm2, %v324_v0, %v1298_v12  ;;  %v1151_v12 = vld [vmem:[%s1803_s10] ss:$0 sm:$0xff] }
 0x208   :  { %v475_v16 = vpack.c.bf16 %v474_v13, %v474_v13  ;;  %v333_v17 = vpack.c.bf16 %v332_v14, %v332_v14  ;;  %v1302_v42 = vpop.permute.xlu1 %1301 }
 0x209   :  { %v1304_v19 = vunpack.i.h.bf16 %v1302_v42  ;;  %v1303_v20 = vunpack.i.l.bf16 %v1302_v42 }
 0x20a   :  { %449 = vmatmul.mubr.bf16.vlgmr.msra.gmra.mrb[4].mxu0 %v333_v17  ;;  %513 = vmatmul.mubr.bf16.vlgmr.msra.gmra.mrb[4].mxu1 %v475_v16 }
 0x20b   :  { %1244 = vmatpush3.bf16.msra.mxu0 %v1333_v15  ;;  %1260 = vmatpush3.bf16.msra.mxu1 %v1333_v15  ;;  %v694_v25 = vsel %vm123_vm1, %v1529_v29, %v1304_v19  ;;  %v591_v26 = vsel %vm123_vm1, %v1521_v27, %v1303_v20  ;;  %v1339_v27 = vld [vmem:[%s1801_s13] sm:$0xff]   ;;  %v1340_v29 = vld [vmem:[%s1801_s13 + $0x8] sm:$0xff]  }
 0x20c   :  { %1245 = vmatprep.subr.bf16.mxu0 %v1355_v2  ;;  %1261 = vmatprep.subr.bf16.mxu1 %v1355_v2  ;;  %v592_v28 = vsel %vm125_vm2, %v591_v26, %v1308_v24  ;;  %v695_v30 = vsel %vm125_vm2, %v694_v25, %v1309_v23 }
 0x20d   :  { %1255 = vmatprep.mubr.msk.bf16.mxu0 %vm1356_vm0, %v1355_v2  ;;  %1271 = vmatprep.mubr.msk.bf16.mxu1 %vm1356_vm0, %v1355_v2  ;;  %v593_v32 = vpack.c.bf16 %v592_v28, %v592_v28  ;;  %v696_v33 = vpack.c.bf16 %v695_v30, %v695_v30 }
 0x20f   :  { %1246 = vmatpush3.bf16.msra.mxu0 %v1334_v35  ;;  %1262 = vmatpush3.bf16.msra.mxu1 %v1334_v35 }
 0x210   :  { %1247 = vmatprep.subr.bf16.mxu0 %v1355_v2  ;;  %1263 = vmatprep.subr.bf16.mxu1 %v1355_v2 }
 0x213   :  { %1248 = vmatpush3.bf16.msra.mxu0 %v1335_v38  ;;  %1264 = vmatpush3.bf16.msra.mxu1 %v1335_v38 }
 0x214   :  { %1249 = vmatprep.subr.bf16.mxu0 %v1355_v2  ;;  %1265 = vmatprep.subr.bf16.mxu1 %v1355_v2 }
 0x217   :  { %1250 = vmatpush3.bf16.msra.mxu0 %v1336_v18  ;;  %1266 = vmatpush3.bf16.msra.mxu1 %v1336_v18 }
 0x218   :  { %1251 = vmatprep.subr.bf16.mxu0 %v1355_v2  ;;  %1267 = vmatprep.subr.bf16.mxu1 %v1355_v2 }
 0x21b   :  { %1252 = vmatpush3.bf16.msra.mxu0 %v1337_v22  ;;  %1268 = vmatpush3.bf16.msra.mxu1 %v1337_v22 }
 0x21c   :  { %1253 = vmatprep.subr.bf16.mxu0 %v1355_v2  ;;  %1269 = vmatprep.subr.bf16.mxu1 %v1355_v2 }
 0x21f   :  { %1254 = vmatpush3.bf16.msra.mxu0 %v1338_v31  ;;  %1270 = vmatpush3.bf16.msra.mxu1 %v1338_v31 }
 0x220   :  { %885 = vmatprep.subr.bf16.mxu0 %v1359_v44  ;;  %948 = vmatprep.subr.bf16.mxu1 %v1359_v44 }
 0x222   :  { %1256 = vmatmul.mubr.msk.bf16.vlgmr.msra.gmra.mrb[8].mxu0 %vm170_vm3, %v593_v32  ;;  %1272 = vmatmul.mubr.msk.bf16.vlgmr.msra.gmra.mrb[8].mxu1 %vm170_vm3, %v696_v33 }
 0x223   :  { %886 = vmatpush1.bf16.msra.mxu0 %v1339_v27  ;;  %949 = vmatpush1.bf16.msra.mxu1 %v1339_v27 }
 0x224   :  { %887 = vmatprep.subr.bf16.mxu0 %v1359_v44  ;;  %950 = vmatprep.subr.bf16.mxu1 %v1359_v44 }
 0x227   :  { %888 = vmatpush1.bf16.msra.mxu0 %v1340_v29  ;;  %951 = vmatpush1.bf16.msra.mxu1 %v1340_v29 }
 0x228   :  { %889 = vmatprep.subr.bf16.mxu0 %v1359_v44  ;;  %952 = vmatprep.subr.bf16.mxu1 %v1359_v44 }
 0x22b   :  { %890 = vmatpush1.bf16.msra.mxu0 %v1341_v34  ;;  %953 = vmatpush1.bf16.msra.mxu1 %v1341_v34 }
 0x22c   :  { %891 = vmatprep.subr.bf16.mxu0 %v1359_v44  ;;  %954 = vmatprep.subr.bf16.mxu1 %v1359_v44 }
 0x22f   :  { %892 = vmatpush1.bf16.msra.mxu0 %v1342_v36  ;;  %955 = vmatpush1.bf16.msra.mxu1 %v1342_v36 }
 0x230   :  { %893 = vmatprep.subr.bf16.mxu0 %v1359_v44  ;;  %956 = vmatprep.subr.bf16.mxu1 %v1359_v44 }
 0x233   :  { %894 = vmatpush1.bf16.msra.mxu0 %v1343_v37  ;;  %957 = vmatpush1.bf16.msra.mxu1 %v1343_v37 }
 0x234   :  { %895 = vmatprep.subr.bf16.mxu0 %v1359_v44  ;;  %958 = vmatprep.subr.bf16.mxu1 %v1359_v44 }
 0x237   :  { %896 = vmatpush1.bf16.msra.mxu0 %v1344_v39  ;;  %959 = vmatpush1.bf16.msra.mxu1 %v1344_v39 }
 0x238   :  { %897 = vmatprep.subr.bf16.mxu0 %v1359_v44  ;;  %960 = vmatprep.subr.bf16.mxu1 %v1359_v44 }
 0x23b   :  { %898 = vmatpush1.bf16.msra.mxu0 %v1345_v40  ;;  %961 = vmatpush1.bf16.msra.mxu1 %v1345_v40 }
 0x23c   :  { %899 = vmatprep.subr.bf16.mxu0 %v1359_v44  ;;  %962 = vmatprep.subr.bf16.mxu1 %v1359_v44 }
 0x23f   :  { %900 = vmatpush1.bf16.msra.mxu0 %v1346_v41  ;;  %963 = vmatpush1.bf16.msra.mxu1 %v1346_v41 }
 0x240   :  { %901 = vmatprep.subr.bf16.mxu0 %v1359_v44  ;;  %964 = vmatprep.subr.bf16.mxu1 %v1359_v44 }
 0x243   :  { %902 = vmatpush1.bf16.msra.mxu0 %v1347_v43  ;;  %965 = vmatpush1.bf16.msra.mxu1 %v1347_v43 }
 0x244   :  { %903 = vmatprep.subr.bf16.mxu0 %v1359_v44  ;;  %966 = vmatprep.subr.bf16.mxu1 %v1359_v44 }
 0x247   :  { %904 = vmatpush1.bf16.msra.mxu0 %v1348_v45  ;;  %967 = vmatpush1.bf16.msra.mxu1 %v1348_v45 }
 0x248   :  { %905 = vmatprep.subr.bf16.mxu0 %v1359_v44  ;;  %968 = vmatprep.subr.bf16.mxu1 %v1359_v44 }
 0x24b   :  { %906 = vmatpush1.bf16.msra.mxu0 %v1349_v46  ;;  %969 = vmatpush1.bf16.msra.mxu1 %v1349_v46 }
 0x24c   :  { %907 = vmatprep.subr.bf16.mxu0 %v1359_v44  ;;  %970 = vmatprep.subr.bf16.mxu1 %v1359_v44 }
 0x2dd   :  { %v450_v48 = vpop.f32.mrb[4].mxu0  ;;  %v514_v49 = vpop.f32.mrb[4].mxu1 }
 0x2de   :  { %v451_v50 = vadd.f32 %v1134_v47, %v450_v48  ;;  %v515_v51 = vadd.f32 %v1134_v47, %v514_v49  ;;  %v452_v52 = vpop.f32.mrb[5].mxu0  ;;  %v516_v54 = vpop.f32.mrb[5].mxu1 }
 0x2df   :  { %v453_v55 = vpop.f32.mrb[6].mxu0  ;;  %v517_v56 = vpop.f32.mrb[6].mxu1 }
 0x2e0   :  { %v456_v57 = vmax.f32 %v451_v50, 0.0  ;;  %v520_v58 = vmax.f32 %v515_v51, 0.0  ;;  %v454_v59 = vpop.f32.mrb[7].mxu0  ;;  %v518_v60 = vpop.f32.mrb[7].mxu1 }
 0x2e2   :  { %v458_v61 = vsel %vm457_vm7, %v456_v57, -inf  ;;  %v521_v62 = vsel %vm457_vm7, %v520_v58, -inf }
 0x2e3   :  { %v459_v44 = vrot.slane %v458_v61, 4  ;;  %v522_v63 = vrot.slane %v521_v62, 4 }
 0x2e5   :  { %v460_v0 = vmax.f32 %v458_v61, %v459_v44  ;;  %v523_v1 = vmax.f32 %v521_v62, %v522_v63  ;;  %v548_v63 = vld [vmem:[%s1804_s11] sm:$0x1] }
 0x2e7   :  { %v461_v5 = vrot.slane %v460_v0, 2  ;;  %v524_v6 = vrot.slane %v523_v1, 2 }
 0x2e9   :  { %v462_v7 = vmax.f32 %v460_v0, %v461_v5  ;;  %v525_v8 = vmax.f32 %v523_v1, %v524_v6  ;;  %v549_v5 = vld [vmem:[%s1805_s12] sm:$0x1] }
 0x2eb   :  { %v463_v9 = vrot.slane %v462_v7, 1  ;;  %v526_v10 = vrot.slane %v525_v8, 1 }
 0x2ed   :  { %v464_v11 = vmax.f32 %v462_v7, %v463_v9  ;;  %v527_v3 = vmax.f32 %v525_v8, %v526_v10  ;;  %v1350_v8 = vld [vmem:[%s1801_s13 + $0x58] sm:$0xff]  }
 0x2ee   :  { %908 = vmatpush1.bf16.msra.mxu0 %v1350_v8  ;;  %971 = vmatpush1.bf16.msra.mxu1 %v1350_v8 }
 0x2ef   :  { %v1734_v4 = vsel %vm528_vm8, %v464_v11, %v527_v3  ;;  %1275 = vmatprep.subr.mxu0 %v1355_v2 }
 0x2f5   :  { %v673_v13 = vpop.f32.mrb[8].mxu0  ;;  %v734_v14 = vpop.f32.mrb[8].mxu1 }
 0x2f6   :  { %v674_v15 = vadd.f32 %v1151_v12, %v673_v13  ;;  %v735_v16 = vadd.f32 %v1151_v12, %v734_v14  ;;  %v1257_v17 = vpop.f32.mrb[9].mxu0  ;;  %v1273_v35 = vpop.f32.mrb[9].mxu1 }
 0x2f7   :  { %v676_v38 = vpop.f32.mrb[10].mxu0  ;;  %v737_v42 = vpop.f32.mrb[10].mxu1 }
 0x2f8   :  { %v679_v18 = vmax.f32 %v674_v15, 0.0  ;;  %v740_v19 = vmax.f32 %v735_v16, 0.0  ;;  %v1258_v20 = vpop.f32.mrb[11].mxu0  ;;  %v1274_v21 = vpop.f32.mrb[11].mxu1 }
 0x2fa   :  { %v741_v22 = vsel %vm125_vm2, %v679_v18, 0.0  ;;  %v748_v23 = vmul.f32 %v679_v18, %v679_v18  ;;  %v756_v24 = vsel %vm125_vm2, %v740_v19, 0.0  ;;  %v764_v25 = vmul.f32 %v740_v19, %v740_v19 }
 0x2fb   :  { %v742_v26 = vrot.slane %v741_v22, 4  ;;  %v757_v28 = vrot.slane %v756_v24, 4 }
 0x2fc   :  { %v749_v30 = vsel %vm125_vm2, %v748_v23, 0.0  ;;  %v765_v31 = vsel %vm125_vm2, %v764_v25, 0.0  ;;  %v997_v25 = vld [vmem:[%s1807_s2] sm:$0x3] }
 0x2fd   :  { %v743_v32 = vadd.f32 %v742_v26, %v741_v22  ;;  %v750_v33 = vrot.slane %v749_v30, 4  ;;  %v758_v27 = vadd.f32 %v757_v28, %v756_v24  ;;  %v766_v29 = vrot.slane %v765_v31, 4  ;;  %v998_v24 = vld [vmem:[%s1806_s15] sm:$0xff] }
 0x2fe   :  { %v26_v26 = vstv %s1808_s20  ;;  %v1160_v28 = vld [vmem:[%s1809_s14] ss:$0 sm:$0xff] }
 0x2ff   :  { %v744_v34 = vrot.slane %v743_v32, 2  ;;  %v751_v36 = vadd.f32 %v750_v33, %v749_v30  ;;  %v759_v37 = vrot.slane %v758_v27, 2  ;;  %v767_v39 = vadd.f32 %v766_v29, %v765_v31  ;;  %27 = vst [vmem:[#allocation2] sm:$0x1] %v26_v26 }
 0x301   :  { %v745_v40 = vadd.f32 %v744_v34, %v743_v32  ;;  %v752_v41 = vrot.slane %v751_v36, 2  ;;  %v760_v43 = vadd.f32 %v759_v37, %v758_v27  ;;  %v768_v45 = vrot.slane %v767_v39, 2 }
 0x303   :  { %v746_v46 = vrot.slane %v745_v40, 1  ;;  %v753_v47 = vadd.f32 %v752_v41, %v751_v36  ;;  %v761_v48 = vrot.slane %v760_v43, 1  ;;  %v769_v49 = vadd.f32 %v768_v45, %v767_v39 }
 0x305   :  { %v747_v50 = vadd.f32 %v746_v46, %v745_v40  ;;  %v754_v51 = vrot.slane %v753_v47, 1  ;;  %v762_v52 = vadd.f32 %v761_v48, %v760_v43  ;;  %v770_v54 = vrot.slane %v769_v49, 1 }
 0x307   :  { %v755_v55 = vadd.f32 %v754_v51, %v753_v47  ;;  %v763_v56 = vadd.f32 %v762_v52, %v747_v50  ;;  %v771_v57 = vadd.f32 %v770_v54, %v769_v49 }
 0x309   :  { %v772_v58 = vadd.f32 %v771_v57, %v755_v55  ;;  %v773_v59 = vmul.f32 0.0625, %v763_v56  ;;  %v1175_v56 = vld [vmem:[%s1810_s16] ss:$0 sm:$0xff] }
 0x30b   :  { %v774_v60 = vmul.f32 0.0625, %v772_v58  ;;  %v775_v61 = vmul.f32 %v773_v59, %v773_v59 }
 0x30d   :  { %v776_v62 = vsub.f32 %v774_v60, %v775_v61 }
 0x30f   :  { %v777_v44 = vadd.f32 1e-05, %v776_v62  ;;  %v1179_v62 = vld [vmem:[%s1811_s19] ss:$0 sm:$0xff] }
 0x311   :  { %1353 = vrsqrt.f32 %v777_v44  ;;  %v1177_v44 = vld [vmem:[%s1812_s17] ss:$0 sm:$0xff] }
 0x31b   :  { %v1354_v0 = vpop.eup %1353 }
 0x31c   :  { %v779_v1 = vmul.f32 %v1354_v0, %v548_v63  ;;  %v1178_v63 = vld [vmem:[%s1813_s18] ss:$0 sm:$0xff] }
 0x31e   :  { %v780_v6 = vmul.f32 %v779_v1, %v773_v59  ;;  %v785_v7 = vrot.slane %v779_v1, %v1612_v53 }
 0x320   :  { %v781_v9 = vsub.f32 %v549_v5, %v780_v6  ;;  %v786_v10 = vmul.f32 %v785_v7, %v679_v18  ;;  %v933_v11 = vmul.f32 %v785_v7, %v740_v19  ;;  %v1087_v5 = vmul.f32 %v1177_v44, %v1734_v4 }
 0x322   :  { %v791_v3 = vrot.slane %v781_v9, %v1612_v53 }
 0x324   :  { %v793_v12 = vadd.f32 %v791_v3, %v786_v10  ;;  %v934_v13 = vadd.f32 %v933_v11, %v791_v3  ;;  %v1180_v10 = vld [vmem:[#allocation2] ss:$0 sm:$0xff] }
 0x326   :  { %v799_v14 = vrot.slane %v793_v12, 2  ;;  %v940_v15 = vrot.slane %v934_v13, 2  ;;  %v795_v16 = vrot.slane %v793_v12, 1  ;;  %v936_v17 = vrot.slane %v934_v13, 1 }
 0x328   :  { %v803_v35 = vpack.c.bf16 %v799_v14, %v799_v14  ;;  %v944_v38 = vpack.c.bf16 %v940_v15, %v940_v15  ;;  %v1310_v42 = vpack.i.bf16 %v936_v17, %v795_v16 }
 0x32a   :  { %1173 = vmatprep.mubr.msk.bf16.mxu0 %vm125_vm2, %v803_v35  ;;  %1174 = vmatprep.mubr.msk.bf16.mxu1 %vm125_vm2, %v944_v38 }
 0x32b   :  { %1311 = vrot.lane.b32.xlu1 %v1310_v42, %s1358_s3 }
 0x39d   :  { %v1312_v18 = vpop.permute.xlu1 %1311 }
 0x39e   :  { %v1314_v19 = vunpack.i.h.bf16 %v1312_v18  ;;  %v1313_v20 = vunpack.i.l.bf16 %v1312_v18 }
 0x3a0   :  { %v942_v53 = vsel %vm125_vm2, %v934_v13, %v1314_v19  ;;  %v801_v21 = vsel %vm125_vm2, %v793_v12, %v1313_v20 }
 0x3a1   :  { %v943_v22 = vpack.c.bf16 %v942_v53, %v942_v53  ;;  %v802_v23 = vpack.c.bf16 %v801_v21, %v801_v21 }
 0x3a3   :  { %918 = vmatmul.mubr.bf16.vlgmr.msra.gmra.mrb[12].mxu0 %v802_v23  ;;  %981 = vmatmul.mubr.bf16.vlgmr.msra.gmra.mrb[12].mxu1 %v943_v22 }
 0x3a4   :  { %1276 = vmatpush3.msra.mxu0 %v998_v24  ;;  %1277 = vmatprep.mubr.msk.f32.mxu0 %vm1356_vm0, %v1355_v2 }
 0x3ab   :  { %1278 = vmatmul.mubr.msk.f32.vlgmr.msra.gmra.mrb[16].mxu0 %vm1006_vm9, %v997_v25 }
 0x476   :  { %v919_v30 = vpop.f32.mrb[12].mxu0  ;;  %v982_v31 = vpop.f32.mrb[12].mxu1 }
 0x477   :  { %v920_v32 = vadd.f32 %v1160_v28, %v919_v30  ;;  %v983_v33 = vadd.f32 %v1160_v28, %v982_v31  ;;  %v921_v2 = vpop.f32.mrb[13].mxu0  ;;  %v984_v27 = vpop.f32.mrb[13].mxu1 }
 0x478   :  { %v922_v29 = vpop.f32.mrb[14].mxu0  ;;  %v985_v34 = vpop.f32.mrb[14].mxu1 }
 0x479   :  { %v925_v36 = vmax.f32 %v920_v32, 0.0  ;;  %v988_v37 = vmax.f32 %v983_v33, 0.0  ;;  %v923_v39 = vpop.f32.mrb[15].mxu0  ;;  %v986_v40 = vpop.f32.mrb[15].mxu1 }
 0x47b   :  { %v926_v41 = vsel %vm271_vm6, %v925_v36, -inf  ;;  %v989_v43 = vsel %vm271_vm6, %v988_v37, -inf }
 0x47c   :  { %v927_v45 = vrot.slane %v926_v41, 4  ;;  %v990_v46 = vrot.slane %v989_v43, 4 }
 0x47e   :  { %v928_v47 = vmax.f32 %v926_v41, %v927_v45  ;;  %v991_v48 = vmax.f32 %v989_v43, %v990_v46  ;;  %v1076_v49 = vpop.f32.mrb[16].mxu0 }
 0x47f   :  { %v1279_v50 = vpop.f32.mrb[17].mxu0  ;;  %v1077_v59 = vadd.f32 %v1175_v56, %v1076_v49 }
 0x480   :  { %v929_v51 = vrot.slane %v928_v47, 2  ;;  %v992_v52 = vrot.slane %v991_v48, 2 }
 0x481   :  { %v1104_v1 = vmul.f32 %v1179_v62, %v1077_v59 }
 0x482   :  { %v930_v54 = vmax.f32 %v928_v47, %v929_v51  ;;  %v993_v55 = vmax.f32 %v991_v48, %v992_v52 }
 0x484   :  { %v931_v57 = vrot.slane %v930_v54, 1  ;;  %v994_v58 = vrot.slane %v993_v55, 1 }
 0x486   :  { %v932_v60 = vmax.f32 %v930_v54, %v931_v57  ;;  %v995_v61 = vmax.f32 %v993_v55, %v994_v58 }
 0x488   :  { %v996_v0 = vsel %vm528_vm8, %v932_v60, %v995_v61 }
 0x489   :  { %v1095_v6 = vmul.f32 %v1178_v63, %v996_v0 }
 0x48b   :  { %v1096_v7 = vadd.f32 %v1095_v6, %v1087_v5 }
 0x48d   :  { %v1105_v8 = vadd.f32 %v1104_v1, %v1096_v7 }
 0x48f   :  { %v1107_v9 = vsel %vm1106_vm10, %v1105_v8, 0.0 }
 0x490   :  { %1108 = vadd.xlane.f32.xlu0 %v1107_v9 }
 0x51d   :  { %v1109_v11 = vpop.xlane.xlu0 %1108 }
 0x51e   :  { %v1117_v3 = vadd.f32 %v1180_v10, %v1109_v11 }
 0x520   :  { %1119 = vst.msk [vmem:[%s1814_s21] sm:$0x3] %vm1118_vm11, %v1117_v3 }

</bundles_post_ra>
